<compile_context>
chip_gen: v7x
topology: tpu7x:2x2x1
jax: 0.10.0
libtpu: 0.0.40
codegen_flags: <defaults>
</compile_context>

<pallas_src>
import functools

import jax
import jax.numpy as jnp
from jax.experimental import pallas as pl
from jax.experimental.pallas import tpu as pltpu


# ----------------------------------------------------------------------------
# Fast path: tiny vocabulary, table fully VMEM-resident, one-hot MXU gather.
# ----------------------------------------------------------------------------
def _onehot_gather_kernel(ids_ref, table_ref, out_ref, *, rows):
    """ids_ref: (bm, 1) int32 VMEM; table_ref: (rows, D) VMEM; out_ref: (bm, D)."""
    ids = jnp.clip(ids_ref[...], 0, rows - 1)                      # (bm, 1)
    iota = jax.lax.broadcasted_iota(jnp.int32, (ids.shape[0], rows), 1)
    one_hot = (ids == iota).astype(table_ref.dtype)                # (bm, rows)
    out_ref[...] = jnp.dot(
        one_hot, table_ref[...], preferred_element_type=jnp.float32
    ).astype(out_ref.dtype)


# ----------------------------------------------------------------------------
# Large-table path: table stays in HBM, per-row DMAs straight into the output
# block, one shared DMA semaphore + single aggregate wait per step.
# ----------------------------------------------------------------------------
def _dma_gather_kernel(ids_ref, table_ref, out_ref, sem, *, block_rows, n, rows):
    """ids_ref: (n,) int32 SMEM (scalar prefetch); table_ref: (rows, D) HBM ref;
    out_ref: (block_rows, D) VMEM output block; sem: scalar DMA semaphore."""
    base = pl.program_id(0) * block_rows

    @pl.loop(0, block_rows)
    def _(j):
        # Clamp the SMEM read for the ragged tail block (rows past `n` gather a
        # duplicate of the last id; they land in the out block's padded region
        # and are never written back to HBM).
        idx = jnp.minimum(base + j, n - 1)
        row = jnp.clip(ids_ref[idx], 0, rows - 1)   # never OOB into HBM
        pltpu.make_async_copy(
            table_ref.at[pl.ds(row, 1), :],          # one (1, D) row in HBM
            out_ref.at[pl.ds(j, 1), :],              # straight into the out block
            sem,
        ).start()

    # All block_rows copies share one semaphore; wait once for the whole
    # block's byte count with a dummy descriptor sized like the output block.
    pltpu.make_async_copy(out_ref, out_ref, sem).wait()


def embedding_gather(ids, table, *, rows_per_step: int = 256, force_dma: bool = False):
    """table[ids] (embedding lookup) via Pallas.  ids: int array, any shape."""
    orig_shape = ids.shape
    ids_flat = ids.reshape(-1).astype(jnp.int32)
    n = ids_flat.shape[0]
    rows, dim = table.shape

    block_rows = max(1, min(rows_per_step, n))
    n_steps = pl.cdiv(n, block_rows)

    table_bytes = rows * dim * jnp.dtype(table.dtype).itemsize
    small_table = (rows <= 2048) and (table_bytes <= (4 << 20))

    if small_table and not force_dma:
        # Whole table resident in VMEM; one-hot MXU gather per output block.
        out = pl.pallas_call(
            functools.partial(_onehot_gather_kernel, rows=rows),
            out_shape=jax.ShapeDtypeStruct((n, dim), table.dtype),
            grid=(n_steps,),
            in_specs=[
                pl.BlockSpec((block_rows, 1), lambda i: (i, 0)),   # ids column
                pl.BlockSpec((rows, dim), lambda i: (0, 0)),       # full table
            ],
            out_specs=pl.BlockSpec((block_rows, dim), lambda i: (i, 0)),
            compiler_params=pltpu.CompilerParams(
                dimension_semantics=("parallel",),
            ),
        )(ids_flat[:, None], table)
    else:
        # TODO(synk): for mid-sized tables (a few MiB) a VMEM-resident jnp.take
        # path would beat per-row DMAs; for ids >> ~100K, block the SMEM ids too.
        out = pl.pallas_call(
            functools.partial(
                _dma_gather_kernel, block_rows=block_rows, n=n, rows=rows
            ),
            out_shape=jax.ShapeDtypeStruct((n, dim), table.dtype),
            grid_spec=pltpu.PrefetchScalarGridSpec(
                num_scalar_prefetch=1,                          # ids -> SMEM
                grid=(n_steps,),
                in_specs=[pl.BlockSpec(memory_space=pl.ANY)],   # table stays in HBM
                out_specs=pl.BlockSpec((block_rows, dim), lambda i, ids: (i, 0)),
                scratch_shapes=[pltpu.SemaphoreType.DMA(())],   # one shared sem
            ),
            compiler_params=pltpu.CompilerParams(
                dimension_semantics=("parallel",),              # multi-TC only on v7x
            ),
        )(ids_flat, table)

    return out.reshape(*orig_shape, dim)


class MyEmbeddingPallas:
    """JAX/Pallas port of MyEmbedding."""

    def __init__(self, num_users: int, num_locations: int, base_dim: int, key):
        ku, kl, kt = jax.random.split(key, 3)
        # nn.Embedding default init: N(0, 1)
        self.user_table = jax.random.normal(ku, (num_users, base_dim), jnp.float32)
        self.location_table = jax.random.normal(kl, (num_locations, base_dim), jnp.float32)
        self.timeslot_table = jax.random.normal(kt, (24, base_dim), jnp.float32)

    def __call__(self, batch_data):
        location_x = batch_data["location_x"]            # (B, S) int

        # loc_emb = location_embedding(location_x) — the only real gather.
        loc_emb = embedding_gather(location_x, self.location_table)

        # timeslot_embedding(arange(24)) / user_embedding(arange(U)) gather every
        # row in order: identity lookup == the table itself, no kernel launched.
        time_emb = self.timeslot_table
        user_emb = self.user_table

        return loc_emb, time_emb, user_emb


if __name__ == "__main__":
    # Small config consistent with the module's forward pass.
    NUM_USERS = 16
    NUM_LOCATIONS = 64
    BASE_DIM = 128
    BATCH, SEQ = 2, 8

    key = jax.random.PRNGKey(0)
    k_params, k_data = jax.random.split(key)

    model = MyEmbeddingPallas(NUM_USERS, NUM_LOCATIONS, BASE_DIM, k_params)

    location_x = jax.random.randint(
        k_data, (BATCH, SEQ), minval=0, maxval=NUM_LOCATIONS, dtype=jnp.int32
    )
    batch_data = {"location_x": location_x}

    loc_emb, time_emb, user_emb = model(batch_data)
    jax.block_until_ready((loc_emb, time_emb, user_emb))

    # Reference check against plain-JAX embedding lookup semantics.
    ref_loc = model.location_table[location_x]
    assert loc_emb.shape == (BATCH, SEQ, BASE_DIM)
    assert time_emb.shape == (24, BASE_DIM)
    assert user_emb.shape == (NUM_USERS, BASE_DIM)
    assert jnp.allclose(loc_emb, ref_loc)
    assert jnp.allclose(time_emb, model.timeslot_table)
    assert jnp.allclose(user_emb, model.user_table)

    # Also exercise the large-table DMA-gather path (incl. a ragged tail block)
    # so both code paths are validated on-device.
    ids_ragged = jax.random.randint(
        jax.random.PRNGKey(1), (13,), minval=0, maxval=NUM_LOCATIONS, dtype=jnp.int32
    )
    dma_out = embedding_gather(
        ids_ragged, model.location_table, rows_per_step=8, force_dma=True
    )
    jax.block_until_ready(dma_out)
    assert dma_out.shape == (13, BASE_DIM)
    assert jnp.allclose(dma_out, model.location_table[ids_ragged])

    print("KERNEL_OK")
</pallas_src>

<mosaic_0001>
module attributes {stable_mosaic.version = 11 : i64} {
  func.func @_onehot_gather_kernel(%arg0: i32, %arg1: memref<16x1xi32, #tpu.memory_space<vmem>>, %arg2: memref<64x128xf32, #tpu.memory_space<vmem>>, %arg3: memref<16x128xf32, #tpu.memory_space<vmem>>) attributes {dimension_semantics = [#tpu.dimension_semantics<parallel>], iteration_bounds = array<i64: 1>, scalar_prefetch = 0 : i64, scratch_operands = 0 : i64, tpu.core_type = #tpu.core_type<tc>, window_params = [{transform_indices = @transform_0, window_bounds = array<i64: 16, 1>}, {pipeline_mode = #tpu.pipeline_mode<synchronous>, transform_indices = @transform_1, window_bounds = array<i64: 64, 128>}, {transform_indices = @transform_2, window_bounds = array<i64: 16, 128>}]} {
    %c0 = arith.constant 0 : index
    %c0_0 = arith.constant 0 : index
    %0 = vector.load %arg1[%c0, %c0_0] : memref<16x1xi32, #tpu.memory_space<vmem>>, vector<16x1xi32>
    %c0_i32 = arith.constant 0 : i32
    %c63_i32 = arith.constant 63 : i32
    %1 = vector.broadcast %c0_i32 : i32 to vector<16x1xi32>
    %2 = arith.maxsi %1, %0 : vector<16x1xi32>
    %3 = vector.broadcast %c63_i32 : i32 to vector<16x1xi32>
    %4 = arith.minsi %3, %2 : vector<16x1xi32>
    %5 = tpu.iota {dimensions = array<i32: 1>} : vector<16x64xi32>
    %6 = vector.broadcast %4 : vector<16x1xi32> to vector<16x64xi32>
    %7 = arith.cmpi eq, %6, %5 : vector<16x64xi32>
    %8 = arith.extui %7 : vector<16x64xi1> to vector<16x64xi32>
    %9 = arith.sitofp %8 : vector<16x64xi32> to vector<16x64xf32>
    %c0_1 = arith.constant 0 : index
    %c0_2 = arith.constant 0 : index
    %10 = vector.load %arg2[%c0_1, %c0_2] : memref<64x128xf32, #tpu.memory_space<vmem>>, vector<64x128xf32>
    %cst = arith.constant dense<0.000000e+00> : vector<16x128xf32>
    %11 = tpu.matmul %9, %10, %cst {dimension_numbers = #tpu.dot_dimension_numbers<[1], [0], [0], [1], [0, 0, 1, 1], [], []>} : vector<16x64xf32>, vector<64x128xf32>, vector<16x128xf32> -> vector<16x128xf32>
    %c0_3 = arith.constant 0 : index
    %c0_4 = arith.constant 0 : index
    %12 = vector.load %arg3[%c0_3, %c0_4] : memref<16x128xf32, #tpu.memory_space<vmem>>, vector<16x128xf32>
    tpu.vector_store %arg3[%c0_3, %c0_4], %11 {strides = array<i32>} : memref<16x128xf32, #tpu.memory_space<vmem>>, vector<16x128xf32>,
    return
  }
  func.func @transform_0(%arg0: i32) -> (i32, i32) {
    %c0_i32 = arith.constant 0 : i32
    %c0_i32_0 = arith.constant 0 : i32
    return %arg0, %c0_i32 : i32, i32
  }
  func.func @transform_1(%arg0: i32) -> (i32, i32) {
    %c0_i32 = arith.constant 0 : i32
    %c0_i32_0 = arith.constant 0 : i32
    %c0_i32_1 = arith.constant 0 : i32
    return %c0_i32, %c0_i32_0 : i32, i32
  }
  func.func @transform_2(%arg0: i32) -> (i32, i32) {
    %c0_i32 = arith.constant 0 : i32
    %c0_i32_0 = arith.constant 0 : i32
    return %arg0, %c0_i32 : i32, i32
  }
}

</mosaic_0001>

<bundles_post_ra>
// kernel: tpu_custom_call.1
= control target key start
LH: loop header
LB: loop body
LE: loop exit
PB: predicated region body
PF: predicated region fallthrough
CT: control target
= control target key end

     0   :  { %7 = vsyncpa [#allocation3], 0  ;;  %s320_s0 = inlined_call_operand.vmem [shape: s32[16,1], index: 0, kind: input, shape index: {}]   ;;  %s321_s1 = inlined_call_operand.hbm [shape: f32[64,128], index: 1, kind: input, shape index: {}]   ;;  %s322_s2 = inlined_call_operand.hbm [shape: f32[16,128], index: 2, kind: output, shape index: {}]  }
   0x1   :  { %8 = vsyncpa [#allocation4], 0  ;;  %s263_s9 = smov [#allocation2]   ;;  %s215_s13 = scalar_lea.hbm %s321_s1, 1024 }
   0x2   :  { %s16_s10 = sshll.u32 %s263_s9, 4  ;;  %p216_p0 = scmp.ne.s32.totalorder %s321_s1, %s215_s13  ;;  %s17_s10 = int_to_ptr.vmem [resolvable:$true] %s16_s10 }
   0x3   :  { %p219_p1 = scmp.lt.u32.totalorder %s215_s13, %s321_s1 }
   0x5   :  { %p221_p2 = pnand %p219_p1, %p216_p0 }
   0x7   :  { %224 = shalt.err (!%p221_p2)
}
   0x8   :  { %s225_s18 = scalar_lea.vmem %s17_s10, 1024  ;;  %p230_p4 = scmp.lt.s32.totalorder %s17_s10, %s17_s10 }
   0x9   :  { %p226_p3 = scmp.ne.s32.totalorder %s17_s10, %s225_s18  ;;  %p231_p5 = scmp.lt.s32.totalorder %s225_s18, %s225_s18 }
   0xb   :  { %p232_p6 = por %p231_p5, %p230_p4 }
   0xd   :  { %p233_p7 = pnand %p232_p6, %p226_p3 }
   0xf   :  { %236 = shalt.err (!%p233_p7)
}
  0x10   :  { %s264_s19 = smov 128   ;;  %s265_s20 = smov 8  }
  0x11   :  { %22 = dma.hbm_to_vmem [thread:$0]  %s321_s1, 1024, %s17_s10, [#allocation3], %s264_s19, %s264_s19, %s265_s20  }
  0x12   :  { %259 = dma.done.wait [#allocation3], 1024  }
  0x13   :  { %260 = vsyncadd [#allocation3], 4294966272  ;;  %v266_v0 = vmov 0   ;;  %v26_v1 = vld [vmem:[%s320_s0] sm:$0xff]  ;;  %v27_v2 = vld [vmem:[%s320_s0 + $0x8] sm:$0xff]  ;;  %v36_v19 = vlaneseq  ;;  %vm58_vm4 = vcmask 523264  }
  0x14   :  { %214 = vset.pattern.permute.xlu0 %v266_v0  ;;  %v50_v3 = vld [vmem:[#allocation2] sm:$0xff]  ;;  %vm28_vm0 = vcmp.gt.s32.totalorder %v26_v1, 0  ;;  %vm30_vm1 = vcmp.gt.s32.totalorder %v27_v2, 0  ;;  %v51_v4 = vld [vmem:[#allocation2 + $0x8] sm:$0xff]  ;;  %v52_v5 = vld [vmem:[#allocation2 + $0x10] sm:$0xff]  ;;  %v267_v22 = vmov 0.0  }
  0x15   :  { %v53_v6 = vld [vmem:[#allocation2 + $0x18] sm:$0xff]  ;;  %v29_v7 = vsel %vm28_vm0, %v26_v1, 0  ;;  %v31_v8 = vsel %vm30_vm1, %v27_v2, 0  ;;  %v192_v9 = vpack.c.bf16 %v51_v4, %v50_v3  ;;  %v54_v11 = vld [vmem:[#allocation2 + $0x20] sm:$0xff]  ;;  %v55_v12 = vld [vmem:[#allocation2 + $0x28] sm:$0xff]  ;;  %v37_v20 = vand.u32 127, %v36_v19 }
  0x16   :  { %v196_v10 = vpack.c.bf16 %v53_v6, %v52_v5  ;;  %vm32_vm2 = vcmp.lt.s32.totalorder %v29_v7, 63  ;;  %vm34_vm3 = vcmp.lt.s32.totalorder %v31_v8, 63  ;;  %v200_v15 = vpack.c.bf16 %v55_v12, %v54_v11  ;;  %v56_v16 = vld [vmem:[#allocation2 + $0x30] sm:$0xff]  ;;  %v57_v17 = vld [vmem:[#allocation2 + $0x38] sm:$0xff]  ;;  %s268_s0 = smov [#allocation5]  }
  0x17   :  { %v33_v13 = vsel %vm32_vm2, %v29_v7, 63  ;;  %193 = vmatprep.subr.bf16.mxu0 %v192_v9  ;;  %v35_v14 = vsel %vm34_vm3, %v31_v8, 63  ;;  %v204_v18 = vpack.c.bf16 %v57_v17, %v56_v16  ;;  %s147_s1 = sshll.u32 %s268_s0, 4  ;;  %s148_s1 = int_to_ptr.vmem [resolvable:$true] %s147_s1 }
  0x18   :  { %39 = vperm.xlu0 %214, %v33_v13   ;;  %195 = vmatpush3.bf16.msra.mxu0 %v192_v9  ;;  %s237_s27 = scalar_lea.vmem %s148_s1, 256  ;;  %p242_p9 = scmp.lt.s32.totalorder %s148_s1, %s148_s1 }
  0x19   :  { %197 = vmatprep.subr.bf16.mxu0 %v196_v10  ;;  %p238_p8 = scmp.ne.s32.totalorder %s148_s1, %s237_s27  ;;  %p243_p10 = scmp.lt.s32.totalorder %s237_s27, %s237_s27 }
  0x1b   :  { %p244_p11 = por %p243_p10, %p242_p9 }
  0x1c   :  { %42 = vperm.xlu0 %214, %v35_v14   ;;  %199 = vmatpush3.bf16.msra.mxu0 %v196_v10 }
  0x1d   :  { %201 = vmatprep.subr.bf16.mxu0 %v200_v15  ;;  %p245_p12 = pnand %p244_p11, %p238_p8 }
  0x20   :  { %203 = vmatpush3.bf16.msra.mxu0 %v200_v15 }
  0x21   :  { %205 = vmatprep.subr.bf16.mxu0 %v204_v18 }
  0x24   :  { %207 = vmatpush3.bf16.msra.mxu0 %v204_v18 }
  0x97   :  { %v40_v21 = vpop.permute.xlu0 %39 }
  0x98   :  { %vm44_vm5 = vcmp.eq.s32.totalorder %v40_v21, %v37_v20 }
  0x99   :  { %v159_v23 = vsel %vm44_vm5, 1.0, %v267_v22 }
  0x9a   :  { %189 = vmatprep.mubr.msk.f32.mxu0 %vm58_vm4, %v159_v23 }
  0x9b   :  { %v43_v24 = vpop.permute.xlu0 %42 }
  0x9c   :  { %vm45_vm6 = vcmp.eq.s32.totalorder %v43_v24, %v37_v20 }
  0x9d   :  { %v160_v25 = vsel %vm45_vm6, 1.0, %v267_v22 }
  0x9e   :  { %190 = vmatmul.mubr.msk.f32.vlgmr.msra.gmra.mrb[0].mxu0 %vm58_vm4, %v160_v25 }
 0x171   :  { %v191_v26 = vpop.f32.mrb[0].mxu0 }
 0x172   :  { %141 = vst [vmem:[#allocation5 + $0x8] sm:$0xff] %v191_v26  ;;  %v131_v27 = vpop.f32.mrb[1].mxu0 }
 0x173   :  { %140 = vst [vmem:[#allocation5] sm:$0xff] %v131_v27 }
 0x174   :  { %248 = shalt.err (!%p245_p12)
}
 0x175   :  { %s249_s30 = scalar_lea.hbm %s322_s2, 256 }
 0x176   :  { %p250_p13 = scmp.ne.s32.totalorder %s322_s2, %s249_s30  ;;  %p253_p0 = scmp.lt.u32.totalorder %s249_s30, %s322_s2 }
 0x178   :  { %p255_p1 = pnand %p253_p0, %p250_p13 }
 0x17a   :  { %258 = shalt.err (!%p255_p1)
}
 0x17b   :  { %153 = dma.vmem_to_hbm [thread:$0]  %s148_s1, 256, %s322_s2, [#allocation4], %s264_s19, %s264_s19, %s265_s20  }
 0x17c   :  { %261 = dma.done.wait [#allocation4], 256  }
 0x17d   :  { %262 = vsyncadd [#allocation4], 4294967040 }
 0x17e   :  { %157 = vsyncpa [#allocation3], 1 }
 0x17f   :  { %158 = vsyncpa [#allocation4], 1 }

</bundles_post_ra>
